<compile_context>
chip_gen: v7x
topology: tpu7x:2x2x1
jax: 0.10.0
libtpu: 0.0.40
codegen_flags: <defaults>
</compile_context>

<pallas_src>
import functools

import jax
import jax.numpy as jnp
from jax.experimental import pallas as pl
from jax.experimental.pallas import tpu as pltpu

NUM_LAYERS = 4
BN_EPS = 1e-5

_VMEM_TILE_BUDGET = 12 * 1024 * 1024     # conservative: fits every generation's scoped default
_VMEM_LIMIT_BYTES = 32 * 1024 * 1024     # >= default scoped limit on v5e/v6e/v7x, <= physical


# ---------------------------------------------------------------------------
# Kernel
# ---------------------------------------------------------------------------
def _mlp_kernel(num_layers, x_ref, w_first_ref, w_rest_ref, vec_ref, b_head_ref, out_ref):
    """Refs:
       x_ref      [TB, F]        bf16  (pipelined batch tile)
       w_first_ref[F, H]         bf16  (resident; BN of previous layer pre-folded)
       w_rest_ref [L-1, H, H]    bf16  (resident)
       vec_ref    [L+1, H]       f32   rows 0..L-1 = layer biases, row L = head weights
       b_head_ref [1, 1]         f32
       out_ref    [1, 1, TB]     f32   lane-dense output row
    """
    h = x_ref[...]                                            # bf16 straight into the MXU
    for i in range(num_layers):
        w = w_first_ref[...] if i == 0 else w_rest_ref[i - 1]  # [in, H] bf16
        b = vec_ref[i]                                          # [H] f32
        a = jnp.dot(h, w, preferred_element_type=jnp.float32) + b   # MXU, f32 accumulation
        h = jnp.maximum(a, 0.0)                                 # ReLU in f32
        if i + 1 < num_layers:
            h = h.astype(jnp.bfloat16)   # carry bf16 between layers (next dot consumes bf16)
        # BatchNorm1d (eval) is folded into the next layer's weights; Dropout is identity.

    # Head Linear(H, 1): MXU-free (VPU multiply + XLU lane reduce), then one small XLU
    # transpose to present a lane-dense [1, TB] row for an unmasked store.
    w_head = vec_ref[num_layers]                                # [H] f32
    col = jnp.sum(h * w_head, axis=-1, keepdims=True)           # [TB, 1] f32
    row = col.T + b_head_ref[...]                               # [1, TB] f32
    out_ref[...] = row.reshape(out_ref.shape).astype(out_ref.dtype)


# ---------------------------------------------------------------------------
# Parameter construction (PyTorch-style raw params) and BN folding / packing
# ---------------------------------------------------------------------------
def init_params(key, input_size, hidden_size=64, num_layers=NUM_LAYERS):
    """Raw parameters mirroring the PyTorch module (Linear U(-1/sqrt(fan_in), ..);
    BatchNorm1d running stats made non-trivial so the fold is actually exercised)."""
    layers = []
    in_dim = input_size
    for _ in range(num_layers):
        key, kw, kb, kg, kbe, km, kv = jax.random.split(key, 7)
        bound = 1.0 / (in_dim ** 0.5)
        w = jax.random.uniform(kw, (in_dim, hidden_size), jnp.float32, -bound, bound)
        b = jax.random.uniform(kb, (hidden_size,), jnp.float32, -bound, bound)
        gamma = jax.random.uniform(kg, (hidden_size,), jnp.float32, 0.5, 1.5)
        beta = 0.1 * jax.random.normal(kbe, (hidden_size,), jnp.float32)
        mean = 0.1 * jax.random.normal(km, (hidden_size,), jnp.float32)
        var = jax.random.uniform(kv, (hidden_size,), jnp.float32, 0.5, 1.5)
        layers.append(dict(w=w, b=b, gamma=gamma, beta=beta, mean=mean, var=var))
        in_dim = hidden_size
    key, kw, kb = jax.random.split(key, 3)
    bound = 1.0 / (hidden_size ** 0.5)
    w_out = jax.random.uniform(kw, (hidden_size, 1), jnp.float32, -bound, bound)
    b_out = jax.random.uniform(kb, (), jnp.float32, -bound, bound)
    return dict(layers=layers, w_out=w_out, b_out=b_out)


def fold_params(raw):
    """Fold eval-mode BatchNorm of layer i (which runs *after* ReLU) into layer i+1 / the
    head, then pack everything into 4 kernel arrays."""
    layers = raw["layers"]
    num_layers = len(layers)
    hidden = layers[0]["w"].shape[1]

    ws, bs = [], []
    prev_scale = prev_shift = None
    for layer in layers:
        w, b = layer["w"], layer["b"]
        if prev_scale is not None:
            b = prev_shift @ w + b
            w = prev_scale[:, None] * w
        ws.append(w)
        bs.append(b)
        scale = layer["gamma"] / jnp.sqrt(layer["var"] + BN_EPS)
        shift = layer["beta"] - layer["mean"] * scale
        prev_scale, prev_shift = scale, shift

    w_out = raw["w_out"][:, 0]                          # [H]
    w_head = prev_scale * w_out                         # [H]
    b_head = jnp.dot(prev_shift, w_out) + raw["b_out"]  # scalar

    w_first = ws[0].astype(jnp.bfloat16)                               # [F, H]
    if num_layers > 1:
        w_rest = jnp.stack(ws[1:]).astype(jnp.bfloat16)                # [L-1, H, H]
    else:
        w_rest = jnp.zeros((1, hidden, hidden), jnp.bfloat16)          # unused placeholder
    vecs = jnp.stack(bs + [w_head]).astype(jnp.float32)                # [L+1, H]
    b_head = jnp.reshape(b_head, (1, 1)).astype(jnp.float32)           # [1, 1]
    return dict(w_first=w_first, w_rest=w_rest, vecs=vecs, b_head=b_head)


# ---------------------------------------------------------------------------
# Wrapper
# ---------------------------------------------------------------------------
def _round_up(x, m):
    return ((x + m - 1) // m) * m


def _vmem_bytes(tb, feat, hidden, num_layers):
    """Rough per-step VMEM footprint (double-buffered pipelined blocks + resident params +
    live intermediates)."""
    x_buf = 2 * tb * feat * 2                                   # bf16 input tile, 2 buffers
    out_buf = 2 * tb * 4                                        # f32 output row, 2 buffers
    w_bytes = 2 * (feat * hidden + max(num_layers - 1, 1) * hidden * hidden) * 2
    vec_bytes = 2 * ((num_layers + 1) * hidden + 1) * 4
    live = tb * hidden * (4 + 2) + tb * max(feat, hidden) * 2   # f32 act + bf16 act + input
    return x_buf + out_buf + w_bytes + vec_bytes + live


@functools.partial(jax.jit, static_argnames=("block_rows",))
def btc_price_predictor(x, folded, *, block_rows=1024):
    """x: [B, input_size] f32, folded: fold_params(...) output -> [B, 1] f32."""
    B, F = x.shape
    w_first, w_rest, vecs, b_head = (folded["w_first"], folded["w_rest"],
                                     folded["vecs"], folded["b_head"])
    num_layers = vecs.shape[0] - 1
    hidden = vecs.shape[1]

    # Batch tile: multiple of 16 sublanes, capped so large batches always yield >= 2 tiles
    # (both v7x TensorCores get work) and the VMEM budget holds on every generation.
    TB = min(block_rows, _round_up(max(pl.cdiv(B, 2), 1), 16))
    while TB > 16 and _vmem_bytes(TB, F, hidden, num_layers) > _VMEM_TILE_BUDGET:
        TB = max(16, _round_up(TB // 2, 16))
    num_tiles = pl.cdiv(B, TB)

    # bf16 input: halves HBM->VMEM DMA for the only pipelined input; the first matmul
    # consumes bf16 operands anyway (jit lets XLA fuse the convert with upstream ops).
    x_bf16 = x.astype(jnp.bfloat16)

    in_specs = [
        pl.BlockSpec((TB, F), lambda i: (i, 0)),                 # pipelined batch tile
        pl.BlockSpec(w_first.shape, lambda i: (0, 0)),           # resident params (constant
        pl.BlockSpec(w_rest.shape, lambda i: (0, 0, 0)),         #  index_map -> no re-DMA)
        pl.BlockSpec(vecs.shape, lambda i: (0, 0)),
        pl.BlockSpec(b_head.shape, lambda i: (0, 0)),
    ]
    # Lane-dense output slab: one full-width row per batch tile.
    out_specs = pl.BlockSpec((1, 1, TB), lambda i: (i, 0, 0))

    out = pl.pallas_call(
        functools.partial(_mlp_kernel, num_layers),
        out_shape=jax.ShapeDtypeStruct((num_tiles, 1, TB), jnp.float32),
        grid=(num_tiles,),
        in_specs=in_specs,
        out_specs=out_specs,
        compiler_params=pltpu.CompilerParams(
            dimension_semantics=("parallel",),       # batch tiles independent (megacore-shardable)
            vmem_limit_bytes=_VMEM_LIMIT_BYTES,
        ),
    )(x_bf16, w_first, w_rest, vecs, b_head)

    # Un-slab: [num_tiles, 1, TB] -> [B, 1] (drops the partial-last-tile garbage rows).
    return out.reshape(num_tiles * TB)[:B].reshape(B, 1)


# ---------------------------------------------------------------------------
# References
# ---------------------------------------------------------------------------
def _reference_fp32(x, raw):
    """Original module semantics in fp32 (Linear -> ReLU -> BN(eval) -> Dropout(id))."""
    h = x
    for layer in raw["layers"]:
        h = jnp.maximum(h @ layer["w"] + layer["b"], 0.0)
        h = (h - layer["mean"]) / jnp.sqrt(layer["var"] + BN_EPS) * layer["gamma"] + layer["beta"]
    return h @ raw["w_out"] + raw["b_out"]


def _reference_quantized(x, folded):
    """Mirror the kernel math (folded BN, bf16 input/weights/activations, f32 accumulation)."""
    num_layers = folded["vecs"].shape[0] - 1
    h = x.astype(jnp.bfloat16)
    for i in range(num_layers):
        w = folded["w_first"] if i == 0 else folded["w_rest"][i - 1]
        b = folded["vecs"][i]
        h = jnp.maximum(jnp.dot(h, w, preferred_element_type=jnp.float32) + b, 0.0)
        if i + 1 < num_layers:
            h = h.astype(jnp.bfloat16)
    w_head = folded["vecs"][num_layers]
    return jnp.sum(h * w_head, axis=-1, keepdims=True) + folded["b_head"][0, 0]


# ---------------------------------------------------------------------------
if __name__ == "__main__":
    key = jax.random.PRNGKey(0)
    k_x, k_x2, k_p = jax.random.split(key, 3)

    batch, input_size, hidden = 8, 16, 32
    raw = init_params(k_p, input_size, hidden_size=hidden, num_layers=NUM_LAYERS)
    folded = fold_params(raw)

    # Small-batch run (single tile, partial block: 8 valid rows inside a 16-row tile).
    x = jax.random.normal(k_x, (batch, input_size), jnp.float32)
    out = jax.block_until_ready(btc_price_predictor(x, folded))
    assert out.shape == (batch, 1)
    assert jnp.allclose(out, _reference_quantized(x, folded), atol=2e-3, rtol=2e-3)
    assert jnp.allclose(out, _reference_fp32(x, raw), atol=1e-1, rtol=1e-1)

    # Multi-tile run with a ragged tail (300 rows, TB=128 -> 3 tiles, last tile 44 valid rows).
    x2 = jax.random.normal(k_x2, (300, input_size), jnp.float32)
    out2 = jax.block_until_ready(btc_price_predictor(x2, folded, block_rows=128))
    assert out2.shape == (300, 1)
    assert jnp.allclose(out2, _reference_quantized(x2, folded), atol=2e-3, rtol=2e-3)

    print("KERNEL_OK")
</pallas_src>

<mosaic_0001>
module attributes {stable_mosaic.version = 11 : i64} {
  func.func @_mlp_kernel(%arg0: i32, %arg1: memref<16x16xbf16, #tpu.memory_space<vmem>>, %arg2: memref<16x32xbf16, #tpu.memory_space<vmem>>, %arg3: memref<3x32x32xbf16, #tpu.memory_space<vmem>>, %arg4: memref<5x32xf32, #tpu.memory_space<vmem>>, %arg5: memref<1x1xf32, #tpu.memory_space<vmem>>, %arg6: memref<1x1x16xf32, #tpu.memory_space<vmem>>) attributes {dimension_semantics = [#tpu.dimension_semantics<parallel>], iteration_bounds = array<i64: 1>, scalar_prefetch = 0 : i64, scratch_operands = 0 : i64, tpu.core_type = #tpu.core_type<tc>, window_params = [{transform_indices = @transform_0, window_bounds = array<i64: 16, 16>}, {pipeline_mode = #tpu.pipeline_mode<synchronous>, transform_indices = @transform_1, window_bounds = array<i64: 16, 32>}, {pipeline_mode = #tpu.pipeline_mode<synchronous>, transform_indices = @transform_2, window_bounds = array<i64: 3, 32, 32>}, {pipeline_mode = #tpu.pipeline_mode<synchronous>, transform_indices = @transform_3, window_bounds = array<i64: 5, 32>}, {pipeline_mode = #tpu.pipeline_mode<synchronous>, transform_indices = @transform_4, window_bounds = array<i64: 1, 1>}, {transform_indices = @transform_5, window_bounds = array<i64: 1, 1, 16>}]} {
    %c0 = arith.constant 0 : index
    %c0_0 = arith.constant 0 : index
    %0 = vector.load %arg1[%c0, %c0_0] : memref<16x16xbf16, #tpu.memory_space<vmem>>, vector<16x16xbf16>
    %c0_1 = arith.constant 0 : index
    %c0_2 = arith.constant 0 : index
    %1 = vector.load %arg2[%c0_1, %c0_2] : memref<16x32xbf16, #tpu.memory_space<vmem>>, vector<16x32xbf16>
    %c0_3 = arith.constant 0 : index
    %c0_4 = arith.constant 0 : index
    %2 = vector.load %arg4[%c0_3, %c0_4] : memref<5x32xf32, #tpu.memory_space<vmem>>, vector<1x32xf32>
    %3 = vector.shape_cast %2 : vector<1x32xf32> to vector<32xf32>
    %cst = arith.constant dense<0.000000e+00> : vector<16x32xf32>
    %4 = tpu.matmul %0, %1, %cst {dimension_numbers = #tpu.dot_dimension_numbers<[1], [0], [0], [1], [0, 0, 1, 1], [], []>} : vector<16x16xbf16>, vector<16x32xbf16>, vector<16x32xf32> -> vector<16x32xf32>
    %5 = vector.shape_cast %3 : vector<32xf32> to vector<1x32xf32>
    %6 = vector.broadcast %5 : vector<1x32xf32> to vector<16x32xf32>
    %7 = arith.addf %4, %6 : vector<16x32xf32>
    %cst_5 = arith.constant 0.000000e+00 : f32
    %8 = vector.broadcast %cst_5 : f32 to vector<16x32xf32>
    %9 = arith.maximumf %7, %8 : vector<16x32xf32>
    %10 = arith.truncf %9 : vector<16x32xf32> to vector<16x32xbf16>
    %c0_6 = arith.constant 0 : index
    %c0_7 = arith.constant 0 : index
    %c0_8 = arith.constant 0 : index
    %11 = vector.load %arg3[%c0_6, %c0_7, %c0_8] : memref<3x32x32xbf16, #tpu.memory_space<vmem>>, vector<1x32x32xbf16>
    %12 = vector.shape_cast %11 : vector<1x32x32xbf16> to vector<32x32xbf16>
    %c1 = arith.constant 1 : index
    %c0_9 = arith.constant 0 : index
    %13 = vector.load %arg4[%c1, %c0_9] : memref<5x32xf32, #tpu.memory_space<vmem>>, vector<1x32xf32>
    %14 = vector.shape_cast %13 : vector<1x32xf32> to vector<32xf32>
    %cst_10 = arith.constant dense<0.000000e+00> : vector<16x32xf32>
    %15 = tpu.matmul %10, %12, %cst_10 {dimension_numbers = #tpu.dot_dimension_numbers<[1], [0], [0], [1], [0, 0, 1, 1], [], []>} : vector<16x32xbf16>, vector<32x32xbf16>, vector<16x32xf32> -> vector<16x32xf32>
    %16 = vector.shape_cast %14 : vector<32xf32> to vector<1x32xf32>
    %17 = vector.broadcast %16 : vector<1x32xf32> to vector<16x32xf32>
    %18 = arith.addf %15, %17 : vector<16x32xf32>
    %cst_11 = arith.constant 0.000000e+00 : f32
    %19 = vector.broadcast %cst_11 : f32 to vector<16x32xf32>
    %20 = arith.maximumf %18, %19 : vector<16x32xf32>
    %21 = arith.truncf %20 : vector<16x32xf32> to vector<16x32xbf16>
    %c1_12 = arith.constant 1 : index
    %c0_13 = arith.constant 0 : index
    %c0_14 = arith.constant 0 : index
    %22 = vector.load %arg3[%c1_12, %c0_13, %c0_14] : memref<3x32x32xbf16, #tpu.memory_space<vmem>>, vector<1x32x32xbf16>
    %23 = vector.shape_cast %22 : vector<1x32x32xbf16> to vector<32x32xbf16>
    %c2 = arith.constant 2 : index
    %c0_15 = arith.constant 0 : index
    %24 = vector.load %arg4[%c2, %c0_15] : memref<5x32xf32, #tpu.memory_space<vmem>>, vector<1x32xf32>
    %25 = vector.shape_cast %24 : vector<1x32xf32> to vector<32xf32>
    %cst_16 = arith.constant dense<0.000000e+00> : vector<16x32xf32>
    %26 = tpu.matmul %21, %23, %cst_16 {dimension_numbers = #tpu.dot_dimension_numbers<[1], [0], [0], [1], [0, 0, 1, 1], [], []>} : vector<16x32xbf16>, vector<32x32xbf16>, vector<16x32xf32> -> vector<16x32xf32>
    %27 = vector.shape_cast %25 : vector<32xf32> to vector<1x32xf32>
    %28 = vector.broadcast %27 : vector<1x32xf32> to vector<16x32xf32>
    %29 = arith.addf %26, %28 : vector<16x32xf32>
    %cst_17 = arith.constant 0.000000e+00 : f32
    %30 = vector.broadcast %cst_17 : f32 to vector<16x32xf32>
    %31 = arith.maximumf %29, %30 : vector<16x32xf32>
    %32 = arith.truncf %31 : vector<16x32xf32> to vector<16x32xbf16>
    %c2_18 = arith.constant 2 : index
    %c0_19 = arith.constant 0 : index
    %c0_20 = arith.constant 0 : index
    %33 = vector.load %arg3[%c2_18, %c0_19, %c0_20] : memref<3x32x32xbf16, #tpu.memory_space<vmem>>, vector<1x32x32xbf16>
    %34 = vector.shape_cast %33 : vector<1x32x32xbf16> to vector<32x32xbf16>
    %c3 = arith.constant 3 : index
    %c0_21 = arith.constant 0 : index
    %35 = vector.load %arg4[%c3, %c0_21] : memref<5x32xf32, #tpu.memory_space<vmem>>, vector<1x32xf32>
    %36 = vector.shape_cast %35 : vector<1x32xf32> to vector<32xf32>
    %cst_22 = arith.constant dense<0.000000e+00> : vector<16x32xf32>
    %37 = tpu.matmul %32, %34, %cst_22 {dimension_numbers = #tpu.dot_dimension_numbers<[1], [0], [0], [1], [0, 0, 1, 1], [], []>} : vector<16x32xbf16>, vector<32x32xbf16>, vector<16x32xf32> -> vector<16x32xf32>
    %38 = vector.shape_cast %36 : vector<32xf32> to vector<1x32xf32>
    %39 = vector.broadcast %38 : vector<1x32xf32> to vector<16x32xf32>
    %40 = arith.addf %37, %39 : vector<16x32xf32>
    %cst_23 = arith.constant 0.000000e+00 : f32
    %41 = vector.broadcast %cst_23 : f32 to vector<16x32xf32>
    %42 = arith.maximumf %40, %41 : vector<16x32xf32>
    %c4 = arith.constant 4 : index
    %c0_24 = arith.constant 0 : index
    %43 = vector.load %arg4[%c4, %c0_24] : memref<5x32xf32, #tpu.memory_space<vmem>>, vector<1x32xf32>
    %44 = vector.shape_cast %43 : vector<1x32xf32> to vector<32xf32>
    %45 = vector.shape_cast %44 : vector<32xf32> to vector<1x32xf32>
    %46 = vector.broadcast %45 : vector<1x32xf32> to vector<16x32xf32>
    %47 = arith.mulf %42, %46 : vector<16x32xf32>
    %cst_25 = arith.constant dense<0.000000e+00> : vector<16xf32>
    %48 = vector.multi_reduction <add>, %47, %cst_25 [1] : vector<16x32xf32> to vector<16xf32>
    %49 = vector.shape_cast %48 : vector<16xf32> to vector<16x1xf32>
    %50 = tpu.transpose %49, [1, 0] : vector<16x1xf32> -> vector<1x16xf32>
    %c0_26 = arith.constant 0 : index
    %c0_27 = arith.constant 0 : index
    %51 = vector.load %arg5[%c0_26, %c0_27] : memref<1x1xf32, #tpu.memory_space<vmem>>, vector<1x1xf32>
    %52 = vector.broadcast %51 : vector<1x1xf32> to vector<1x16xf32>
    %53 = arith.addf %50, %52 : vector<1x16xf32>
    %54 = vector.shape_cast %53 : vector<1x16xf32> to vector<1x1x16xf32>
    %c0_28 = arith.constant 0 : index
    %c0_29 = arith.constant 0 : index
    %c0_30 = arith.constant 0 : index
    %55 = vector.load %arg6[%c0_28, %c0_29, %c0_30] : memref<1x1x16xf32, #tpu.memory_space<vmem>>, vector<1x1x16xf32>
    tpu.vector_store %arg6[%c0_28, %c0_29, %c0_30], %54 {strides = array<i32>} : memref<1x1x16xf32, #tpu.memory_space<vmem>>, vector<1x1x16xf32>,
    return
  }
  func.func @transform_0(%arg0: i32) -> (i32, i32) {
    %c0_i32 = arith.constant 0 : i32
    %c0_i32_0 = arith.constant 0 : i32
    return %arg0, %c0_i32 : i32, i32
  }
  func.func @transform_1(%arg0: i32) -> (i32, i32) {
    %c0_i32 = arith.constant 0 : i32
    %c0_i32_0 = arith.constant 0 : i32
    %c0_i32_1 = arith.constant 0 : i32
    return %c0_i32, %c0_i32_0 : i32, i32
  }
  func.func @transform_2(%arg0: i32) -> (i32, i32, i32) {
    %c0_i32 = arith.constant 0 : i32
    %c0_i32_0 = arith.constant 0 : i32
    %c0_i32_1 = arith.constant 0 : i32
    %c0_i32_2 = arith.constant 0 : i32
    return %c0_i32, %c0_i32_0, %c0_i32_1 : i32, i32, i32
  }
  func.func @transform_3(%arg0: i32) -> (i32, i32) {
    %c0_i32 = arith.constant 0 : i32
    %c0_i32_0 = arith.constant 0 : i32
    %c0_i32_1 = arith.constant 0 : i32
    return %c0_i32, %c0_i32_0 : i32, i32
  }
  func.func @transform_4(%arg0: i32) -> (i32, i32) {
    %c0_i32 = arith.constant 0 : i32
    %c0_i32_0 = arith.constant 0 : i32
    %c0_i32_1 = arith.constant 0 : i32
    return %c0_i32, %c0_i32_0 : i32, i32
  }
  func.func @transform_5(%arg0: i32) -> (i32, i32, i32) {
    %c0_i32 = arith.constant 0 : i32
    %c0_i32_0 = arith.constant 0 : i32
    %c0_i32_1 = arith.constant 0 : i32
    return %arg0, %c0_i32, %c0_i32_0 : i32, i32, i32
  }
}

</mosaic_0001>

<bundles_post_ra>
// kernel: btc_price_predictor.1
= control target key start
LH: loop header
LB: loop body
LE: loop exit
PB: predicated region body
PF: predicated region fallthrough
CT: control target
= control target key end

     0   :  { %s556_s0 = inlined_call_operand.vmem [shape: bf16[8,16], index: 0, kind: input, shape index: {}]   ;;  %s557_s1 = inlined_call_operand.vmem [shape: bf16[16,32], index: 1, kind: input, shape index: {}]   ;;  %s558_s2 = inlined_call_operand.hbm [shape: bf16[3,32,32], index: 2, kind: input, shape index: {}]   ;;  %s559_s3 = inlined_call_operand.vmem [shape: f32[5,32], index: 3, kind: input, shape index: {}]   ;;  %s560_s4 = inlined_call_operand.<no memory space> [shape: f32[1,1], index: 4, kind: input, shape index: {}]   ;;  %s561_s5 = inlined_call_operand.vmem [shape: f32[1,1,16], index: 5, kind: output, shape index: {}]  }
   0x1   :  { %v10_v0 = vstv %s560_s4 }
   0x2   :  { %11 = vst [vmem:[#allocation2] sm:$0x1] %v10_v0 }
   0x3   :  { %12 = vsyncpa [#allocation4], 0  ;;  %s472_s20 = smov [#allocation3]   ;;  %s448_s24 = scalar_lea.hbm %s558_s2, 768 }
   0x4   :  { %s22_s21 = sshll.u32 %s472_s20, 4  ;;  %p449_p0 = scmp.ne.s32.totalorder %s558_s2, %s448_s24  ;;  %s23_s21 = int_to_ptr.vmem [resolvable:$true] %s22_s21 }
   0x5   :  { %p452_p1 = scmp.lt.u32.totalorder %s448_s24, %s558_s2 }
   0x7   :  { %p454_p2 = pnand %p452_p1, %p449_p0 }
   0x9   :  { %457 = shalt.err (!%p454_p2)
}
   0xa   :  { %s458_s4 = scalar_lea.vmem %s23_s21, 768  ;;  %p463_p4 = scmp.lt.s32.totalorder %s23_s21, %s23_s21 }
   0xb   :  { %p459_p3 = scmp.ne.s32.totalorder %s23_s21, %s458_s4  ;;  %p464_p5 = scmp.lt.s32.totalorder %s458_s4, %s458_s4 }
   0xd   :  { %p465_p6 = por %p464_p5, %p463_p4 }
   0xf   :  { %p466_p7 = pnand %p465_p6, %p459_p3 }
  0x11   :  { %469 = shalt.err (!%p466_p7)
}
  0x12   :  { %s473_s29 = smov 64   ;;  %s474_s30 = smov 4  }
  0x13   :  { %28 = dma.hbm_to_vmem [thread:$0]  %s558_s2, 768, %s23_s21, [#allocation4], %s473_s29, %s473_s29, %s474_s30  }
  0x14   :  { %470 = dma.done.wait [#allocation4], 768  }
  0x15   :  { %471 = vsyncadd [#allocation4], 4294966528  ;;  %v475_v1 = vmov 0.0   ;;  %vm476_vm0 = vmmov 0   ;;  %v440_v2 = vld [vmem:[%s557_s1] sm:$0xff]   ;;  %vm57_vm1 = vcmask 130048   ;;  %v362_v58 = vlaneseq }
  0x16   :  { %402 = vmatprep.subr.bf16.mxu0 %v475_v1  ;;  %404 = vmatprep.mubr.msk.bf16.mxu0 %vm476_vm0, %v475_v1  ;;  %v441_v3 = vld [vmem:[%s556_s0] sm:$0xff]   ;;  %v443_v5 = vld [vmem:[#allocation3 + $0x8] sm:$0xff]   ;;  %vm126_vm2 = vcmask 261120   ;;  %v444_v16 = vld [vmem:[#allocation3 + $0x10] sm:$0xff]   ;;  %v477_v41 = vmov 0   ;;  %vm367_vm3 = vcmask 122880  }
  0x17   :  { %408 = vmatprep.subr.bf16.mxu1 %v475_v1  ;;  %412 = vmatprep.mubr.msk.bf16.mxu1 %vm476_vm0, %v475_v1  ;;  %v442_v4 = vld [vmem:[#allocation3] sm:$0xff]   ;;  %v374_v6 = vld [vmem:[%s559_s3] ss:$0 sm:$0xff]  ;;  %v447_v29 = vld [vmem:[#allocation3 + $0x28] sm:$0xff]   ;;  %v363_v59 = vshrl.u32 %v362_v58, 7 }
  0x18   :  { %403 = vmatpush3.bf16.msra.mxu0 %v440_v2  ;;  %409 = vmatpush3.bf16.msra.mxu1 %v442_v4  ;;  %v445_v17 = vld [vmem:[#allocation3 + $0x18] sm:$0xff]   ;;  %v378_v18 = vld [vmem:[%s559_s3 + $0x1] ss:$0 sm:$0xff]  ;;  %v382_v30 = vld [vmem:[%s559_s3 + $0x2] ss:$0 sm:$0xff] }
  0x19   :  { %416 = vmatprep.subr.bf16.mxu0 %v475_v1  ;;  %410 = vmatprep.subr.bf16.mxu1 %v475_v1  ;;  %v446_v28 = vld [vmem:[#allocation3 + $0x20] sm:$0xff]   ;;  %v356_v40 = vld [vmem:[#allocation2] sm:$0x1]  ;;  %v364_v60 = vsub.s32 0, %v363_v59 }
  0x1a   :  { %438 = vset.pattern.permute.xlu1 %v477_v41  ;;  %439 = vset.pattern.permute.xlu0 %v477_v41  ;;  %v386_v42 = vld [vmem:[%s559_s3 + $0x3] ss:$0 sm:$0xff]  ;;  %v390_v47 = vld [vmem:[%s559_s3 + $0x4] ss:$0 sm:$0xff] }
  0x1b   :  { %405 = vmatmul.mubr.msk.bf16.vlgmr.msra.gmra.mrb[0].mxu0 %vm57_vm1, %v441_v3  ;;  %359 = vperm.xlu1 %438, %v356_v40  }
  0x1c   :  { %420 = vmatprep.mubr.msk.bf16.mxu0 %vm476_vm0, %v475_v1  ;;  %411 = vmatpush3.bf16.msra.mxu1 %v443_v5 }
  0x1d   :  { %424 = vmatprep.subr.bf16.mxu1 %v475_v1  ;;  %417 = vmatpush3.bf16.msra.mxu0 %v444_v16 }
  0x1e   :  { %418 = vmatprep.subr.bf16.mxu0 %v475_v1 }
  0x21   :  { %419 = vmatpush3.bf16.msra.mxu0 %v445_v17 }
  0x9a   :  { %v360_v61 = vpop.permute.xlu1 %359 }
  0x9b   :  { %v365_v62 = vrot.slane %v360_v61, %v364_v60 }
  0xee   :  { %v95_v7 = vpop.f32.mrb[0].mxu0 }
  0xef   :  { %v96_v8 = vadd.f32 %v374_v6, %v95_v7  ;;  %v406_v9 = vpop.f32.mrb[1].mxu0 }
  0xf0   :  { %v98_v10 = vpop.f32.mrb[2].mxu0 }
  0xf1   :  { %v99_v11 = vadd.f32 %v374_v6, %v98_v10  ;;  %v407_v12 = vpop.f32.mrb[3].mxu0  ;;  %v102_v13 = vmax.f32 %v96_v8, 0.0 }
  0xf3   :  { %v103_v14 = vmax.f32 %v99_v11, 0.0 }
  0xf5   :  { %v104_v15 = vpack.c.bf16 %v103_v14, %v102_v13 }
  0xf7   :  { %413 = vmatmul.mubr.msk.bf16.vlgmr.msra.gmra.mrb[0].mxu1 %vm126_vm2, %v104_v15 }
  0xf8   :  { %428 = vmatprep.mubr.msk.bf16.mxu1 %vm476_vm0, %v475_v1  ;;  %425 = vmatpush3.bf16.msra.mxu1 %v446_v28 }
  0xf9   :  { %426 = vmatprep.subr.bf16.mxu1 %v475_v1 }
  0xfc   :  { %427 = vmatpush3.bf16.msra.mxu1 %v447_v29 }
 0x1ca   :  { %v164_v19 = vpop.f32.mrb[0].mxu1 }
 0x1cb   :  { %v165_v20 = vadd.f32 %v378_v18, %v164_v19  ;;  %v414_v21 = vpop.f32.mrb[1].mxu1 }
 0x1cc   :  { %v167_v22 = vpop.f32.mrb[2].mxu1 }
 0x1cd   :  { %v168_v23 = vadd.f32 %v378_v18, %v167_v22  ;;  %v415_v24 = vpop.f32.mrb[3].mxu1  ;;  %v171_v25 = vmax.f32 %v165_v20, 0.0 }
 0x1cf   :  { %v172_v26 = vmax.f32 %v168_v23, 0.0 }
 0x1d1   :  { %v173_v27 = vpack.c.bf16 %v172_v26, %v171_v25 }
 0x1d3   :  { %421 = vmatmul.mubr.msk.bf16.vlgmr.msra.gmra.mrb[4].mxu0 %vm126_vm2, %v173_v27 }
 0x2a6   :  { %v233_v31 = vpop.f32.mrb[4].mxu0 }
 0x2a7   :  { %v234_v32 = vadd.f32 %v382_v30, %v233_v31  ;;  %v422_v33 = vpop.f32.mrb[5].mxu0 }
 0x2a8   :  { %v236_v34 = vpop.f32.mrb[6].mxu0 }
 0x2a9   :  { %v237_v35 = vadd.f32 %v382_v30, %v236_v34  ;;  %v423_v36 = vpop.f32.mrb[7].mxu0  ;;  %v240_v37 = vmax.f32 %v234_v32, 0.0 }
 0x2ab   :  { %v241_v38 = vmax.f32 %v237_v35, 0.0 }
 0x2ad   :  { %v242_v39 = vpack.c.bf16 %v241_v38, %v240_v37 }
 0x2af   :  { %429 = vmatmul.mubr.msk.bf16.vlgmr.msra.gmra.mrb[4].mxu1 %vm126_vm2, %v242_v39 }
 0x382   :  { %v302_v43 = vpop.f32.mrb[4].mxu1 }
 0x383   :  { %v303_v44 = vadd.f32 %v386_v42, %v302_v43  ;;  %v430_v45 = vpop.f32.mrb[5].mxu1 }
 0x384   :  { %v305_v46 = vpop.f32.mrb[6].mxu1 }
 0x385   :  { %v309_v48 = vmax.f32 %v303_v44, 0.0  ;;  %v306_v49 = vadd.f32 %v386_v42, %v305_v46  ;;  %v431_v50 = vpop.f32.mrb[7].mxu1 }
 0x387   :  { %v310_v51 = vmax.f32 %v306_v49, 0.0  ;;  %v316_v52 = vmul.f32 %v390_v47, %v309_v48 }
 0x389   :  { %v318_v53 = vsel %vm126_vm2, %v316_v52, 0.0  ;;  %v317_v54 = vmul.f32 %v390_v47, %v310_v51 }
 0x38a   :  { %319 = vadd.xlane.f32.xlu0 %v318_v53 }
 0x38b   :  { %v321_v55 = vsel %vm126_vm2, %v317_v54, 0.0 }
 0x38e   :  { %322 = vadd.xlane.f32.xlu0 %v321_v55 }
 0x417   :  { %v320_v56 = vpop.xlane.xlu0 %319 }
 0x418   :  { %324 = vxpose.xlu1.b32.start [1/2] (short) (narrow) %v320_v56, 8 }
 0x41b   :  { %v323_v57 = vpop.xlane.xlu0 %322 }
 0x41c   :  { %325 = vxpose.xlu1.b32.end [2/2] (short) (narrow) %v323_v57, 8 }
 0x498   :  { %v340_v63 = vpop.trf.xlu1 }
 0x499   :  { %v366_v0 = vadd.f32 %v365_v62, %v340_v63 }
 0x49b   :  { %368 = vst.msk [vmem:[%s561_s5] sm:$0x1] %vm367_vm3, %v366_v0 }
 0x49c   :  { %373 = vsyncpa [#allocation4], 1 }

</bundles_post_ra>
